<compile_context>
chip_gen: v7x
topology: tpu7x:2x2x1
jax: 0.10.0
libtpu: 0.0.40
codegen_flags: <defaults>
</compile_context>

<pallas_src>
import functools

import jax
import jax.numpy as jnp
from jax import lax
from jax.experimental import pallas as pl
from jax.experimental.pallas import tpu as pltpu


def shsa_kernel(x1_ref, x2_ref, gnw_ref, gnb_ref,
                wq_ref, wk_ref, wv_ref, bq_ref, bk_ref, bv_ref,
                wp1_ref, wp2_ref, bp_ref, o_ref, *, eps):
    """Processes one (b_blk, N, ...) batch block.  All refs are VMEM tiles."""
    bb, n, pd = x1_ref.shape
    x1 = x1_ref[...].astype(jnp.float32)                # bf16 in HBM, f32 math

    # --- pre_norm: GroupNorm(1, pdim), per-sample stats, two-pass (stable) --
    inv_cnt = 1.0 / float(n * pd)
    mean = jnp.sum(x1, axis=(1, 2), keepdims=True) * inv_cnt
    xc = x1 - mean
    var = jnp.sum(xc * xc, axis=(1, 2), keepdims=True) * inv_cnt
    x1n = xc * lax.rsqrt(var + eps)
    x1n = x1n * gnw_ref[0] + gnb_ref[0]                 # per-channel affine

    x1n_flat = x1n.reshape(bb * n, pd).astype(jnp.bfloat16)

    # --- qkv: fused 1x1 Conv+BN, weights pre-split (no lane slicing).
    #     Attention scale is pre-folded into wq / bq by the wrapper. ---------
    q = jnp.dot(x1n_flat, wq_ref[...],
                preferred_element_type=jnp.float32) + bq_ref[0]
    k = jnp.dot(x1n_flat, wk_ref[...],
                preferred_element_type=jnp.float32) + bk_ref[0]
    v = jnp.dot(x1n_flat, wv_ref[...],
                preferred_element_type=jnp.float32) + bv_ref[0]

    qb = q.reshape(bb, n, -1).astype(jnp.bfloat16)      # [bb, N, qk]
    kb = k.reshape(bb, n, -1).astype(jnp.bfloat16)      # [bb, N, qk]
    vb = v.reshape(bb, n, -1).astype(jnp.bfloat16)      # [bb, N, pdim]

    # --- attention (per sample, batched einsum on the MXU) ------------------
    s = jnp.einsum("bqd,bkd->bqk", qb, kb,
                   preferred_element_type=jnp.float32)          # [bb, N, N]
    s = s - jnp.max(s, axis=-1, keepdims=True)
    p = jnp.exp(s)
    denom = jnp.sum(p, axis=-1, keepdims=True)
    attn = p * pl.reciprocal(denom, approx=True)                # EUP divide
    x1o = jnp.einsum("bqk,bkd->bqd", attn.astype(jnp.bfloat16), vb,
                     preferred_element_type=jnp.float32)        # [bb, N, pdim]

    # --- proj: SiLU then fused 1x1 Conv+BN, weight pre-split (no concat) ----
    h1 = x1o * jax.nn.sigmoid(x1o)
    x2 = x2_ref[...].astype(jnp.float32)
    h2 = x2 * jax.nn.sigmoid(x2)
    h1f = h1.reshape(bb * n, -1).astype(jnp.bfloat16)
    h2f = h2.reshape(bb * n, -1).astype(jnp.bfloat16)

    out = jnp.dot(h1f, wp1_ref[...], preferred_element_type=jnp.float32)
    out = out + jnp.dot(h2f, wp2_ref[...], preferred_element_type=jnp.float32)
    out = out + bp_ref[0]
    o_ref[...] = out.reshape(bb, n, -1).astype(o_ref.dtype)     # bf16 store


def _pick_b_blk(B, N, C, vmem_budget_bytes):
    """Largest divisor of B that (a) fits a rough per-block VMEM budget and
    (b) leaves >= 2 grid steps (DMA pipelining + v7x megacore split);
    prefers >= 4 steps when possible."""
    def block_bytes(bb):
        scores = 2 * bb * N * N * 4          # s + p/attn live together (f32)
        temps = 6 * bb * N * C * 4           # x1/x1n/q/k/v/x1o/h/out chain (f32)
        io = 2 * 2 * bb * N * C * 2          # double-buffered bf16 in + out blocks
        return scores + temps + io

    divisors = sorted((d for d in range(1, B + 1) if B % d == 0), reverse=True)
    for want_steps in (4, 2, 1):
        for bb in divisors:
            if B // bb >= min(want_steps, B) and block_bytes(bb) <= vmem_budget_bytes:
                return bb
    return 1


def shsa_forward(x_nchw, params, *, qk_dim, pdim, b_blk=None,
                 vmem_budget_bytes=24 << 20):
    B, C, H, W = x_nchw.shape
    dim = C
    N = H * W
    scale = float(qk_dim) ** -0.5

    if b_blk is None:
        b_blk = _pick_b_blk(B, N, dim, vmem_budget_bytes)
    assert B % b_blk == 0

    # TODO(synk): the NCHW->[B,N,C] transpose / x1-x2 split and the transpose
    # back cost ~3 extra HBM passes outside the kernel; keep the surrounding
    # model channels-last (or fuse into the consumer) to avoid them.
    x = jnp.transpose(x_nchw, (0, 2, 3, 1)).reshape(B, N, C)
    x1 = x[..., :pdim].astype(jnp.bfloat16)     # bf16 HBM I/O: halves DMA bytes
    x2 = x[..., pdim:].astype(jnp.bfloat16)

    bf16 = lambda a: a.astype(jnp.bfloat16)
    # pre-split qkv weight/bias and proj weight in the wrapper (free in XLA);
    # fold the attention scale into wq / bq (weight folding).
    wq = bf16(params["w_qkv"][:, :qk_dim] * scale)
    wk = bf16(params["w_qkv"][:, qk_dim:2 * qk_dim])
    wv = bf16(params["w_qkv"][:, 2 * qk_dim:])
    bq = params["b_qkv"][:, :qk_dim] * scale
    bk = params["b_qkv"][:, qk_dim:2 * qk_dim]
    bv = params["b_qkv"][:, 2 * qk_dim:]
    wp1 = bf16(params["w_proj"][:pdim])
    wp2 = bf16(params["w_proj"][pdim:])
    bp = params["b_proj"]

    kernel = functools.partial(shsa_kernel, eps=1e-5)
    const2d = lambda b: (0, 0)

    out = pl.pallas_call(
        kernel,
        out_shape=jax.ShapeDtypeStruct((B, N, dim), jnp.bfloat16),
        grid=(B // b_blk,),
        in_specs=[
            pl.BlockSpec((b_blk, N, pdim), lambda b: (b, 0, 0)),        # x1
            pl.BlockSpec((b_blk, N, dim - pdim), lambda b: (b, 0, 0)),  # x2
            pl.BlockSpec((1, pdim), const2d),                           # gn w
            pl.BlockSpec((1, pdim), const2d),                           # gn b
            pl.BlockSpec((pdim, qk_dim), const2d),                      # wq
            pl.BlockSpec((pdim, qk_dim), const2d),                      # wk
            pl.BlockSpec((pdim, pdim), const2d),                        # wv
            pl.BlockSpec((1, qk_dim), const2d),                         # bq
            pl.BlockSpec((1, qk_dim), const2d),                         # bk
            pl.BlockSpec((1, pdim), const2d),                           # bv
            pl.BlockSpec((pdim, dim), const2d),                         # wp1
            pl.BlockSpec((dim - pdim, dim), const2d),                   # wp2
            pl.BlockSpec((1, dim), const2d),                            # bp
        ],
        out_specs=pl.BlockSpec((b_blk, N, dim), lambda b: (b, 0, 0)),
        compiler_params=pltpu.CompilerParams(
            dimension_semantics=("parallel",),
            vmem_limit_bytes=32 << 20),
    )(x1, x2, params["gn_w"], params["gn_b"],
      wq, wk, wv, bq, bk, bv, wp1, wp2, bp)

    # back to NCHW to match the PyTorch module's output convention
    return jnp.transpose(out.reshape(B, H, W, dim), (0, 3, 1, 2))


def shsa_reference(x_nchw, params, *, qk_dim, pdim):
    """Pure-JAX f32 reference mirroring the PyTorch forward (fused BN)."""
    B, C, H, W = x_nchw.shape
    N = H * W
    x = jnp.transpose(x_nchw, (0, 2, 3, 1)).reshape(B, N, C)
    x1, x2 = x[..., :pdim], x[..., pdim:]
    mean = jnp.mean(x1, axis=(1, 2), keepdims=True)
    var = jnp.var(x1, axis=(1, 2), keepdims=True)
    x1n = (x1 - mean) / jnp.sqrt(var + 1e-5)
    x1n = x1n * params["gn_w"][0] + params["gn_b"][0]
    qkv = jnp.einsum("bnc,cd->bnd", x1n, params["w_qkv"]) + params["b_qkv"][0]
    q, k, v = (qkv[..., :qk_dim], qkv[..., qk_dim:2 * qk_dim],
               qkv[..., 2 * qk_dim:])
    attn = jnp.einsum("bqd,bkd->bqk", q, k) * (float(qk_dim) ** -0.5)
    attn = jax.nn.softmax(attn, axis=-1)
    x1o = jnp.einsum("bqk,bkd->bqd", attn, v)
    h = jnp.concatenate([x1o, x2], axis=-1)
    h = h * jax.nn.sigmoid(h)
    out = jnp.einsum("bnc,cd->bnd", h, params["w_proj"]) + params["b_proj"][0]
    return jnp.transpose(out.reshape(B, H, W, C), (0, 3, 1, 2))


def init_params(key, dim, qk_dim, pdim):
    """Deterministic synthetic params.  Conv2d_BN layers stored pre-fused
    as [Cin, Cout] matmul weight + [1, Cout] bias; GroupNorm uses module
    defaults (weight=1, bias=0)."""
    qk2p = 2 * qk_dim + pdim
    k1, k2, k3, k4 = jax.random.split(key, 4)
    return {
        "gn_w": jnp.ones((1, pdim), jnp.float32),
        "gn_b": jnp.zeros((1, pdim), jnp.float32),
        "w_qkv": jax.random.normal(k1, (pdim, qk2p), jnp.float32) * (pdim ** -0.5),
        "b_qkv": jax.random.normal(k2, (1, qk2p), jnp.float32) * 0.1,
        "w_proj": jax.random.normal(k3, (dim, dim), jnp.float32) * (dim ** -0.5),
        "b_proj": jax.random.normal(k4, (1, dim), jnp.float32) * 0.1,
    }


if __name__ == "__main__":
    B, dim, H, W = 4, 64, 8, 8          # grid of 4 batch blocks -> pipelined
    qk_dim, pdim = 16, 32

    root = jax.random.PRNGKey(0)
    kx, kp = jax.random.split(root)
    x = jax.random.normal(kx, (B, dim, H, W), jnp.float32)   # NCHW like PyTorch
    params = init_params(kp, dim, qk_dim, pdim)

    y = shsa_forward(x, params, qk_dim=qk_dim, pdim=pdim)
    jax.block_until_ready(y)
    assert y.shape == (B, dim, H, W)

    # sanity check against a pure-f32 JAX reference (bf16 I/O + bf16 MXU tol)
    y_ref = shsa_reference(x, params, qk_dim=qk_dim, pdim=pdim)
    y32 = y.astype(jnp.float32)
    assert bool(jnp.isfinite(y32).all())
    assert float(jnp.max(jnp.abs(y32 - y_ref))) < 0.15

    print("KERNEL_OK")
</pallas_src>

<mosaic_0001>
module attributes {stable_mosaic.version = 11 : i64} {
  func.func @shsa_kernel(%arg0: i32, %arg1: memref<1x64x32xbf16, #tpu.memory_space<vmem>>, %arg2: memref<1x64x32xbf16, #tpu.memory_space<vmem>>, %arg3: memref<1x32xf32, #tpu.memory_space<vmem>>, %arg4: memref<1x32xf32, #tpu.memory_space<vmem>>, %arg5: memref<32x16xbf16, #tpu.memory_space<vmem>>, %arg6: memref<32x16xbf16, #tpu.memory_space<vmem>>, %arg7: memref<32x32xbf16, #tpu.memory_space<vmem>>, %arg8: memref<1x16xf32, #tpu.memory_space<vmem>>, %arg9: memref<1x16xf32, #tpu.memory_space<vmem>>, %arg10: memref<1x32xf32, #tpu.memory_space<vmem>>, %arg11: memref<32x64xbf16, #tpu.memory_space<vmem>>, %arg12: memref<32x64xbf16, #tpu.memory_space<vmem>>, %arg13: memref<1x64xf32, #tpu.memory_space<vmem>>, %arg14: memref<1x64x64xbf16, #tpu.memory_space<vmem>>) attributes {dimension_semantics = [#tpu.dimension_semantics<parallel>], iteration_bounds = array<i64: 4>, scalar_prefetch = 0 : i64, scratch_operands = 0 : i64, tpu.core_type = #tpu.core_type<tc>, window_params = [{transform_indices = @transform_0, window_bounds = array<i64: 1, 64, 32>}, {transform_indices = @transform_1, window_bounds = array<i64: 1, 64, 32>}, {pipeline_mode = #tpu.pipeline_mode<synchronous>, transform_indices = @transform_2, window_bounds = array<i64: 1, 32>}, {pipeline_mode = #tpu.pipeline_mode<synchronous>, transform_indices = @transform_3, window_bounds = array<i64: 1, 32>}, {pipeline_mode = #tpu.pipeline_mode<synchronous>, transform_indices = @transform_4, window_bounds = array<i64: 32, 16>}, {pipeline_mode = #tpu.pipeline_mode<synchronous>, transform_indices = @transform_5, window_bounds = array<i64: 32, 16>}, {pipeline_mode = #tpu.pipeline_mode<synchronous>, transform_indices = @transform_6, window_bounds = array<i64: 32, 32>}, {pipeline_mode = #tpu.pipeline_mode<synchronous>, transform_indices = @transform_7, window_bounds = array<i64: 1, 16>}, {pipeline_mode = #tpu.pipeline_mode<synchronous>, transform_indices = @transform_8, window_bounds = array<i64: 1, 16>}, {pipeline_mode = #tpu.pipeline_mode<synchronous>, transform_indices = @transform_9, window_bounds = array<i64: 1, 32>}, {pipeline_mode = #tpu.pipeline_mode<synchronous>, transform_indices = @transform_10, window_bounds = array<i64: 32, 64>}, {pipeline_mode = #tpu.pipeline_mode<synchronous>, transform_indices = @transform_11, window_bounds = array<i64: 32, 64>}, {pipeline_mode = #tpu.pipeline_mode<synchronous>, transform_indices = @transform_12, window_bounds = array<i64: 1, 64>}, {transform_indices = @transform_13, window_bounds = array<i64: 1, 64, 64>}]} {
    %c0 = arith.constant 0 : index
    %c0_0 = arith.constant 0 : index
    %c0_1 = arith.constant 0 : index
    %0 = vector.load %arg1[%c0, %c0_0, %c0_1] : memref<1x64x32xbf16, #tpu.memory_space<vmem>>, vector<1x64x32xbf16>
    %1 = arith.extf %0 : vector<1x64x32xbf16> to vector<1x64x32xf32>
    %cst = arith.constant dense<0.000000e+00> : vector<1xf32>
    %2 = vector.multi_reduction <add>, %1, %cst [1, 2] : vector<1x64x32xf32> to vector<1xf32>
    %3 = vector.shape_cast %2 : vector<1xf32> to vector<1x1x1xf32>
    %cst_2 = arith.constant 4.8828125E-4 : f32
    %4 = vector.broadcast %cst_2 : f32 to vector<1x1x1xf32>
    %5 = arith.mulf %3, %4 : vector<1x1x1xf32>
    %6 = vector.broadcast %5 : vector<1x1x1xf32> to vector<1x64x32xf32>
    %7 = arith.subf %1, %6 : vector<1x64x32xf32>
    %8 = arith.mulf %7, %7 : vector<1x64x32xf32>
    %cst_3 = arith.constant dense<0.000000e+00> : vector<1xf32>
    %9 = vector.multi_reduction <add>, %8, %cst_3 [1, 2] : vector<1x64x32xf32> to vector<1xf32>
    %10 = vector.shape_cast %9 : vector<1xf32> to vector<1x1x1xf32>
    %cst_4 = arith.constant 4.8828125E-4 : f32
    %11 = vector.broadcast %cst_4 : f32 to vector<1x1x1xf32>
    %12 = arith.mulf %10, %11 : vector<1x1x1xf32>
    %cst_5 = arith.constant 9.99999974E-6 : f32
    %13 = vector.broadcast %cst_5 : f32 to vector<1x1x1xf32>
    %14 = arith.addf %12, %13 : vector<1x1x1xf32>
    %15 = math.rsqrt %14 : vector<1x1x1xf32>
    %16 = vector.broadcast %15 : vector<1x1x1xf32> to vector<1x64x32xf32>
    %17 = arith.mulf %7, %16 : vector<1x64x32xf32>
    %c0_6 = arith.constant 0 : index
    %c0_7 = arith.constant 0 : index
    %18 = vector.load %arg3[%c0_6, %c0_7] : memref<1x32xf32, #tpu.memory_space<vmem>>, vector<1x32xf32>
    %19 = vector.shape_cast %18 : vector<1x32xf32> to vector<32xf32>
    %20 = vector.shape_cast %19 : vector<32xf32> to vector<1x1x32xf32>
    %21 = vector.broadcast %20 : vector<1x1x32xf32> to vector<1x64x32xf32>
    %22 = arith.mulf %17, %21 : vector<1x64x32xf32>
    %c0_8 = arith.constant 0 : index
    %c0_9 = arith.constant 0 : index
    %23 = vector.load %arg4[%c0_8, %c0_9] : memref<1x32xf32, #tpu.memory_space<vmem>>, vector<1x32xf32>
    %24 = vector.shape_cast %23 : vector<1x32xf32> to vector<32xf32>
    %25 = vector.shape_cast %24 : vector<32xf32> to vector<1x1x32xf32>
    %26 = vector.broadcast %25 : vector<1x1x32xf32> to vector<1x64x32xf32>
    %27 = arith.addf %22, %26 : vector<1x64x32xf32>
    %28 = vector.shape_cast %27 : vector<1x64x32xf32> to vector<64x32xf32>
    %29 = arith.truncf %28 : vector<64x32xf32> to vector<64x32xbf16>
    %c0_10 = arith.constant 0 : index
    %c0_11 = arith.constant 0 : index
    %30 = vector.load %arg5[%c0_10, %c0_11] : memref<32x16xbf16, #tpu.memory_space<vmem>>, vector<32x16xbf16>
    %cst_12 = arith.constant dense<0.000000e+00> : vector<64x16xf32>
    %31 = tpu.matmul %29, %30, %cst_12 {dimension_numbers = #tpu.dot_dimension_numbers<[1], [0], [0], [1], [0, 0, 1, 1], [], []>} : vector<64x32xbf16>, vector<32x16xbf16>, vector<64x16xf32> -> vector<64x16xf32>
    %c0_13 = arith.constant 0 : index
    %c0_14 = arith.constant 0 : index
    %32 = vector.load %arg8[%c0_13, %c0_14] : memref<1x16xf32, #tpu.memory_space<vmem>>, vector<1x16xf32>
    %33 = vector.shape_cast %32 : vector<1x16xf32> to vector<16xf32>
    %34 = vector.shape_cast %33 : vector<16xf32> to vector<1x16xf32>
    %35 = vector.broadcast %34 : vector<1x16xf32> to vector<64x16xf32>
    %36 = arith.addf %31, %35 : vector<64x16xf32>
    %c0_15 = arith.constant 0 : index
    %c0_16 = arith.constant 0 : index
    %37 = vector.load %arg6[%c0_15, %c0_16] : memref<32x16xbf16, #tpu.memory_space<vmem>>, vector<32x16xbf16>
    %cst_17 = arith.constant dense<0.000000e+00> : vector<64x16xf32>
    %38 = tpu.matmul %29, %37, %cst_17 {dimension_numbers = #tpu.dot_dimension_numbers<[1], [0], [0], [1], [0, 0, 1, 1], [], []>} : vector<64x32xbf16>, vector<32x16xbf16>, vector<64x16xf32> -> vector<64x16xf32>
    %c0_18 = arith.constant 0 : index
    %c0_19 = arith.constant 0 : index
    %39 = vector.load %arg9[%c0_18, %c0_19] : memref<1x16xf32, #tpu.memory_space<vmem>>, vector<1x16xf32>
    %40 = vector.shape_cast %39 : vector<1x16xf32> to vector<16xf32>
    %41 = vector.shape_cast %40 : vector<16xf32> to vector<1x16xf32>
    %42 = vector.broadcast %41 : vector<1x16xf32> to vector<64x16xf32>
    %43 = arith.addf %38, %42 : vector<64x16xf32>
    %c0_20 = arith.constant 0 : index
    %c0_21 = arith.constant 0 : index
    %44 = vector.load %arg7[%c0_20, %c0_21] : memref<32x32xbf16, #tpu.memory_space<vmem>>, vector<32x32xbf16>
    %cst_22 = arith.constant dense<0.000000e+00> : vector<64x32xf32>
    %45 = tpu.matmul %29, %44, %cst_22 {dimension_numbers = #tpu.dot_dimension_numbers<[1], [0], [0], [1], [0, 0, 1, 1], [], []>} : vector<64x32xbf16>, vector<32x32xbf16>, vector<64x32xf32> -> vector<64x32xf32>
    %c0_23 = arith.constant 0 : index
    %c0_24 = arith.constant 0 : index
    %46 = vector.load %arg10[%c0_23, %c0_24] : memref<1x32xf32, #tpu.memory_space<vmem>>, vector<1x32xf32>
    %47 = vector.shape_cast %46 : vector<1x32xf32> to vector<32xf32>
    %48 = vector.shape_cast %47 : vector<32xf32> to vector<1x32xf32>
    %49 = vector.broadcast %48 : vector<1x32xf32> to vector<64x32xf32>
    %50 = arith.addf %45, %49 : vector<64x32xf32>
    %51 = vector.shape_cast %36 : vector<64x16xf32> to vector<1x64x16xf32>
    %52 = arith.truncf %51 : vector<1x64x16xf32> to vector<1x64x16xbf16>
    %53 = vector.shape_cast %43 : vector<64x16xf32> to vector<1x64x16xf32>
    %54 = arith.truncf %53 : vector<1x64x16xf32> to vector<1x64x16xbf16>
    %55 = vector.shape_cast %50 : vector<64x32xf32> to vector<1x64x32xf32>
    %56 = arith.truncf %55 : vector<1x64x32xf32> to vector<1x64x32xbf16>
    "tpu.trace_start"() <{level = 10 : i32, message = "bqd,bkd->bqk"}> : () -> ()
    %cst_25 = arith.constant dense<0.000000e+00> : vector<1x64x64xf32>
    %57 = tpu.matmul %52, %54, %cst_25 {dimension_numbers = #tpu.dot_dimension_numbers<[2], [2], [1], [1], [0, 0, 0, 1, 1, 1], [0], [0]>} : vector<1x64x16xbf16>, vector<1x64x16xbf16>, vector<1x64x64xf32> -> vector<1x64x64xf32>
    "tpu.trace_stop"() : () -> ()
    %cst_26 = arith.constant dense<0xFF800000> : vector<1x64xf32>
    %58 = vector.multi_reduction <maximumf>, %57, %cst_26 [2] : vector<1x64x64xf32> to vector<1x64xf32>
    %59 = vector.shape_cast %58 : vector<1x64xf32> to vector<1x64x1xf32>
    %60 = vector.broadcast %59 : vector<1x64x1xf32> to vector<1x64x64xf32>
    %61 = arith.subf %57, %60 : vector<1x64x64xf32>
    %62 = math.exp %61 : vector<1x64x64xf32>
    %cst_27 = arith.constant dense<0.000000e+00> : vector<1x64xf32>
    %63 = vector.multi_reduction <add>, %62, %cst_27 [2] : vector<1x64x64xf32> to vector<1x64xf32>
    %64 = vector.shape_cast %63 : vector<1x64xf32> to vector<1x64x1xf32>
    %65 = tpu.reciprocal %64 {approx = true} : vector<1x64x1xf32> -> vector<1x64x1xf32>
    %66 = vector.broadcast %65 : vector<1x64x1xf32> to vector<1x64x64xf32>
    %67 = arith.mulf %62, %66 : vector<1x64x64xf32>
    %68 = arith.truncf %67 : vector<1x64x64xf32> to vector<1x64x64xbf16>
    "tpu.trace_start"() <{level = 10 : i32, message = "bqk,bkd->bqd"}> : () -> ()
    %cst_28 = arith.constant dense<0.000000e+00> : vector<1x64x32xf32>
    %69 = tpu.matmul %68, %56, %cst_28 {dimension_numbers = #tpu.dot_dimension_numbers<[2], [1], [1], [2], [0, 0, 0, 1, 1, 2], [0], [0]>} : vector<1x64x64xbf16>, vector<1x64x32xbf16>, vector<1x64x32xf32> -> vector<1x64x32xf32>
    "tpu.trace_stop"() : () -> ()
    %70 = arith.negf %69 : vector<1x64x32xf32>
    %71 = math.exp %70 : vector<1x64x32xf32>
    %cst_29 = arith.constant 1.000000e+00 : f32
    %72 = vector.broadcast %cst_29 : f32 to vector<1x64x32xf32>
    %73 = arith.addf %72, %71 : vector<1x64x32xf32>
    %74 = arith.divf %72, %73 : vector<1x64x32xf32>
    %75 = arith.mulf %69, %74 : vector<1x64x32xf32>
    %c0_30 = arith.constant 0 : index
    %c0_31 = arith.constant 0 : index
    %c0_32 = arith.constant 0 : index
    %76 = vector.load %arg2[%c0_30, %c0_31, %c0_32] : memref<1x64x32xbf16, #tpu.memory_space<vmem>>, vector<1x64x32xbf16>
    %77 = arith.extf %76 : vector<1x64x32xbf16> to vector<1x64x32xf32>
    %78 = arith.negf %77 : vector<1x64x32xf32>
    %79 = math.exp %78 : vector<1x64x32xf32>
    %cst_33 = arith.constant 1.000000e+00 : f32
    %80 = vector.broadcast %cst_33 : f32 to vector<1x64x32xf32>
    %81 = arith.addf %80, %79 : vector<1x64x32xf32>
    %82 = arith.divf %80, %81 : vector<1x64x32xf32>
    %83 = arith.mulf %77, %82 : vector<1x64x32xf32>
    %84 = vector.shape_cast %75 : vector<1x64x32xf32> to vector<64x32xf32>
    %85 = arith.truncf %84 : vector<64x32xf32> to vector<64x32xbf16>
    %86 = vector.shape_cast %83 : vector<1x64x32xf32> to vector<64x32xf32>
    %87 = arith.truncf %86 : vector<64x32xf32> to vector<64x32xbf16>
    %c0_34 = arith.constant 0 : index
    %c0_35 = arith.constant 0 : index
    %88 = vector.load %arg11[%c0_34, %c0_35] : memref<32x64xbf16, #tpu.memory_space<vmem>>, vector<32x64xbf16>
    %cst_36 = arith.constant dense<0.000000e+00> : vector<64x64xf32>
    %89 = tpu.matmul %85, %88, %cst_36 {dimension_numbers = #tpu.dot_dimension_numbers<[1], [0], [0], [1], [0, 0, 1, 1], [], []>} : vector<64x32xbf16>, vector<32x64xbf16>, vector<64x64xf32> -> vector<64x64xf32>
    %c0_37 = arith.constant 0 : index
    %c0_38 = arith.constant 0 : index
    %90 = vector.load %arg12[%c0_37, %c0_38] : memref<32x64xbf16, #tpu.memory_space<vmem>>, vector<32x64xbf16>
    %cst_39 = arith.constant dense<0.000000e+00> : vector<64x64xf32>
    %91 = tpu.matmul %87, %90, %cst_39 {dimension_numbers = #tpu.dot_dimension_numbers<[1], [0], [0], [1], [0, 0, 1, 1], [], []>} : vector<64x32xbf16>, vector<32x64xbf16>, vector<64x64xf32> -> vector<64x64xf32>
    %92 = arith.addf %89, %91 : vector<64x64xf32>
    %c0_40 = arith.constant 0 : index
    %c0_41 = arith.constant 0 : index
    %93 = vector.load %arg13[%c0_40, %c0_41] : memref<1x64xf32, #tpu.memory_space<vmem>>, vector<1x64xf32>
    %94 = vector.shape_cast %93 : vector<1x64xf32> to vector<64xf32>
    %95 = vector.shape_cast %94 : vector<64xf32> to vector<1x64xf32>
    %96 = vector.broadcast %95 : vector<1x64xf32> to vector<64x64xf32>
    %97 = arith.addf %92, %96 : vector<64x64xf32>
    %98 = vector.shape_cast %97 : vector<64x64xf32> to vector<1x64x64xf32>
    %99 = arith.truncf %98 : vector<1x64x64xf32> to vector<1x64x64xbf16>
    %c0_42 = arith.constant 0 : index
    %c0_43 = arith.constant 0 : index
    %c0_44 = arith.constant 0 : index
    %100 = vector.load %arg14[%c0_42, %c0_43, %c0_44] : memref<1x64x64xbf16, #tpu.memory_space<vmem>>, vector<1x64x64xbf16>
    tpu.vector_store %arg14[%c0_42, %c0_43, %c0_44], %99 {strides = array<i32>} : memref<1x64x64xbf16, #tpu.memory_space<vmem>>, vector<1x64x64xbf16>,
    return
  }
  func.func @transform_0(%arg0: i32) -> (i32, i32, i32) {
    %c0_i32 = arith.constant 0 : i32
    %c0_i32_0 = arith.constant 0 : i32
    %c0_i32_1 = arith.constant 0 : i32
    return %arg0, %c0_i32, %c0_i32_0 : i32, i32, i32
  }
  func.func @transform_1(%arg0: i32) -> (i32, i32, i32) {
    %c0_i32 = arith.constant 0 : i32
    %c0_i32_0 = arith.constant 0 : i32
    %c0_i32_1 = arith.constant 0 : i32
    return %arg0, %c0_i32, %c0_i32_0 : i32, i32, i32
  }
  func.func @transform_2(%arg0: i32) -> (i32, i32) {
    %c0_i32 = arith.constant 0 : i32
    %c0_i32_0 = arith.constant 0 : i32
    %c0_i32_1 = arith.constant 0 : i32
    return %c0_i32, %c0_i32_0 : i32, i32
  }
  func.func @transform_3(%arg0: i32) -> (i32, i32) {
    %c0_i32 = arith.constant 0 : i32
    %c0_i32_0 = arith.constant 0 : i32
    %c0_i32_1 = arith.constant 0 : i32
    return %c0_i32, %c0_i32_0 : i32, i32
  }
  func.func @transform_4(%arg0: i32) -> (i32, i32) {
    %c0_i32 = arith.constant 0 : i32
    %c0_i32_0 = arith.constant 0 : i32
    %c0_i32_1 = arith.constant 0 : i32
    return %c0_i32, %c0_i32_0 : i32, i32
  }
  func.func @transform_5(%arg0: i32) -> (i32, i32) {
    %c0_i32 = arith.constant 0 : i32
    %c0_i32_0 = arith.constant 0 : i32
    %c0_i32_1 = arith.constant 0 : i32
    return %c0_i32, %c0_i32_0 : i32, i32
  }
  func.func @transform_6(%arg0: i32) -> (i32, i32) {
    %c0_i32 = arith.constant 0 : i32
    %c0_i32_0 = arith.constant 0 : i32
    %c0_i32_1 = arith.constant 0 : i32
    return %c0_i32, %c0_i32_0 : i32, i32
  }
  func.func @transform_7(%arg0: i32) -> (i32, i32) {
    %c0_i32 = arith.constant 0 : i32
    %c0_i32_0 = arith.constant 0 : i32
    %c0_i32_1 = arith.constant 0 : i32
    return %c0_i32, %c0_i32_0 : i32, i32
  }
  func.func @transform_8(%arg0: i32) -> (i32, i32) {
    %c0_i32 = arith.constant 0 : i32
    %c0_i32_0 = arith.constant 0 : i32
    %c0_i32_1 = arith.constant 0 : i32
    return %c0_i32, %c0_i32_0 : i32, i32
  }
  func.func @transform_9(%arg0: i32) -> (i32, i32) {
    %c0_i32 = arith.constant 0 : i32
    %c0_i32_0 = arith.constant 0 : i32
    %c0_i32_1 = arith.constant 0 : i32
    return %c0_i32, %c0_i32_0 : i32, i32
  }
  func.func @transform_10(%arg0: i32) -> (i32, i32) {
    %c0_i32 = arith.constant 0 : i32
    %c0_i32_0 = arith.constant 0 : i32
    %c0_i32_1 = arith.constant 0 : i32
    return %c0_i32, %c0_i32_0 : i32, i32
  }
  func.func @transform_11(%arg0: i32) -> (i32, i32) {
    %c0_i32 = arith.constant 0 : i32
    %c0_i32_0 = arith.constant 0 : i32
    %c0_i32_1 = arith.constant 0 : i32
    return %c0_i32, %c0_i32_0 : i32, i32
  }
  func.func @transform_12(%arg0: i32) -> (i32, i32) {
    %c0_i32 = arith.constant 0 : i32
    %c0_i32_0 = arith.constant 0 : i32
    %c0_i32_1 = arith.constant 0 : i32
    return %c0_i32, %c0_i32_0 : i32, i32
  }
  func.func @transform_13(%arg0: i32) -> (i32, i32, i32) {
    %c0_i32 = arith.constant 0 : i32
    %c0_i32_0 = arith.constant 0 : i32
    %c0_i32_1 = arith.constant 0 : i32
    return %arg0, %c0_i32, %c0_i32_0 : i32, i32, i32
  }
}

</mosaic_0001>

<bundles_post_ra>
// kernel: tpu_custom_call.1
= control target key start
LH: loop header
LB: loop body
LE: loop exit
PB: predicated region body
PF: predicated region fallthrough
CT: control target
= control target key end

     0   :  { %s2416_s0 = inlined_call_operand.vmem [shape: bf16[4,64,32], index: 0, kind: input, shape index: {}]   ;;  %s2417_s1 = inlined_call_operand.vmem [shape: bf16[4,64,32], index: 1, kind: input, shape index: {}]   ;;  %s2418_s2 = inlined_call_operand.vmem [shape: f32[1,32], index: 2, kind: input, shape index: {}]   ;;  %s2419_s3 = inlined_call_operand.vmem [shape: f32[1,32], index: 3, kind: input, shape index: {}]   ;;  %s2420_s4 = inlined_call_operand.vmem [shape: bf16[32,16], index: 4, kind: input, shape index: {}]   ;;  %s2421_s5 = inlined_call_operand.vmem [shape: bf16[32,16], index: 5, kind: input, shape index: {}]   ;;  %s2422_s6 = inlined_call_operand.vmem [shape: bf16[32,32], index: 6, kind: input, shape index: {}]   ;;  %s2423_s7 = inlined_call_operand.vmem [shape: f32[1,16], index: 7, kind: input, shape index: {}]   ;;  %s2424_s8 = inlined_call_operand.vmem [shape: f32[1,16], index: 8, kind: input, shape index: {}]   ;;  %s2425_s9 = inlined_call_operand.vmem [shape: f32[1,32], index: 9, kind: input, shape index: {}]   ;;  %s2426_s10 = inlined_call_operand.vmem [shape: bf16[32,64], index: 10, kind: input, shape index: {}]   ;;  %s2427_s11 = inlined_call_operand.vmem [shape: bf16[32,64], index: 11, kind: input, shape index: {}]   ;;  %s2428_s12 = inlined_call_operand.vmem [shape: f32[1,64], index: 12, kind: input, shape index: {}]   ;;  %s2429_s13 = inlined_call_operand.hbm [shape: bf16[4,64,64], index: 13, kind: output, shape index: {}]  }
   0x1   :  { %2431 = sst [smem:[#allocation5_spill]] %s2416_s0 }
   0x2   :  { %2432 = sst [smem:[#allocation6_spill]] %s2417_s1 }
   0x3   :  { %18 = vsyncpa [#allocation3], 0 }
   0x4   :  { %20 = vsyncpa [#allocation3 + $0x1], 0  ;;  %s2166_s25 = smov 0   ;;  %s2168_s26 = smov 0  }
   0x5   :  { %s2170_s27 = smov 0   ;;  %s2172_s28 = smov 0  }
   0x6 LB: > { %s2187_s29 = sadd.s32 4294967295, %s2091_s28   ;;  %s1599_s30 = sadd.s32 4294967294, %s2091_s28   ;;  %s2091_s28 = sphi %s2172_s28, %s2441_s28   ;;  %s2087_s27 = sphi %s2170_s27, %s2440_s27   ;;  %s2083_s26 = sphi %s2168_s26, %s2439_s26   ;;  %s2079_s25 = sphi %s2166_s25, %s2438_s25  }
   0x7   : > { %s2191_s14 = sadd.s32 1, %s2091_s28   ;;  %s316_s15 = sadd.s32 1, %s2087_s27 }
   0x8   : > { %s313_s16 = ssub.s32 %s2091_s28, %s2191_s14  ;;  %p326_p0 = scmp.ne.s32.totalorder %s2087_s27, %s2083_s26 }
   0x9   : > { %p314_p1 = scmp.eq.s32.totalorder %s313_s16, 0  ;;  %p327_p2 = scmp.eq.s32.totalorder %s2187_s29, 3 }
   0xa   : > { %p332_p3 = scmp.ne.s32.totalorder %s2083_s26, %s2079_s25  ;;  %p333_p4 = scmp.eq.s32.totalorder %s1599_s30, 3 }
   0xb   : > { %s2202_s17 = scalar_select %p314_p1, %s2087_s27, %s316_s15  }
   0xc   : > { %p2204_p5 = por %p327_p2, %p326_p0  ;;  %p2208_p6 = por %p333_p4, %p332_p3 }
   0xd   : > { %p1602_p7 = scmp.ge.s32.totalorder %s2091_s28, 1  ;;  %p400_p8 = scmp.lt.s32.totalorder %s2091_s28, 5 }
   0xf   : > { %p401_p9 = pnand %p1602_p7, %p400_p8 }
  0x10   : > { %p449_p10 = scmp.lt.s32.totalorder (!%p401_p9), %s2187_s29, 3  ;;  %s2435_s0 = sld [smem:[#allocation5_spill]] (!%p401_p9)  ;;  %vm476_vm0 = vcmask (!%p401_p9), 261120   ;;  %vm873_vm1 = vcmask (!%p401_p9), 130048   ;;  %vm963_vm2 = vcmask (!%p401_p9), 523264   ;;  %vm1502_vm3 = vcmask (!%p401_p9), 519168  }
  0x11   : > { %404 = sbr.rel (%p401_p9) target bundleno = 1692 (0x69c), region = 72  ;;  %s2437_s1 = sld [smem:[#allocation6_spill]] (!%p401_p9) }
  0x12   : > { %s1691_s22 = sshll.u32 (!%p401_p9), %s2187_s29, 9 }
  0x18   : > { %s2216_s20 = scalar_select %p449_p10, %s2187_s29, 3 }
  0x1a   : > { %s2430_s21 = sshll.u32 %s2216_s20, 5  ;;  %s2436_s23 = sshll.u32 %s2216_s20, 5 }
  0x1b   : > { %s453_s24 = scalar_lea.vmem %s2435_s0, %s2430_s21  ;;  %s458_s15 = scalar_lea.vmem %s2437_s1, %s2436_s23 }
  0x1c   : > { %v1693_v0 = vld [vmem:[%s453_s24] sm:$0xff]   ;;  %v1724_v1 = vld [vmem:[%s453_s24 + $0x8] sm:$0xff]   ;;  %v1725_v2 = vld [vmem:[%s453_s24 + $0x10] sm:$0xff]   ;;  %s2366_s20 = scalar_lea.hbm %s2429_s13, %s1691_s22 }
  0x1d   : > { %v1694_v3 = vunpack.c.l.bf16 %v1693_v0  ;;  %v1695_v4 = vunpack.c.h.bf16 %v1693_v0  ;;  %v1698_v5 = vunpack.c.l.bf16 %v1724_v1  ;;  %v1699_v6 = vunpack.c.h.bf16 %v1724_v1  ;;  %v1726_v11 = vld [vmem:[%s453_s24 + $0x18] sm:$0xff]  }
  0x1e   : > { %v1702_v7 = vunpack.c.l.bf16 %v1725_v2  ;;  %v1703_v13 = vunpack.c.h.bf16 %v1725_v2  ;;  %v1706_v16 = vunpack.c.l.bf16 %v1726_v11  ;;  %v1707_v19 = vunpack.c.h.bf16 %v1726_v11  ;;  %v1921_v2 = vld [vmem:[%s2420_s4] sm:$0xff]  }
  0x1f   : > { %v477_v8 = vsel %vm476_vm0, %v1694_v3, 0.0  ;;  %v478_v9 = vsel %vm476_vm0, %v1695_v4, 0.0  ;;  %v480_v10 = vsel %vm476_vm0, %v1698_v5, 0.0  ;;  %v482_v14 = vsel %vm476_vm0, %v1699_v6, 0.0  ;;  %1776 = vmatprep.subr.bf16.mxu1 %v1921_v2 }
  0x20   : > { %v479_v12 = vadd.f32 %v478_v9, %v477_v8  ;;  %v484_v17 = vsel %vm476_vm0, %v1702_v7, 0.0  ;;  %v486_v20 = vsel %vm476_vm0, %v1703_v13, 0.0  ;;  %v488_v22 = vsel %vm476_vm0, %v1706_v16, 0.0  ;;  %1777 = vmatpush3.bf16.msra.mxu1 %v1921_v2 }
  0x21   : > { %v490_v24 = vsel %vm476_vm0, %v1707_v19, 0.0 }
  0x22   : > { %v481_v15 = vadd.f32 %v480_v10, %v479_v12 }
  0x24   : > { %v483_v18 = vadd.f32 %v482_v14, %v481_v15 }
  0x26   : > { %v485_v21 = vadd.f32 %v484_v17, %v483_v18  ;;  %v1608_v17 = vld [vmem:[%s2418_s2] ss:$0 sm:$0xff] }
  0x28   : > { %v487_v23 = vadd.f32 %v486_v20, %v485_v21 }
  0x2a   : > { %v489_v25 = vadd.f32 %v488_v22, %v487_v23  ;;  %v1609_v22 = vld [vmem:[%s2419_s3] ss:$0 sm:$0xff] }
  0x2c   : > { %v491_v26 = vadd.f32 %v490_v24, %v489_v25 }
  0x2e   : > { %492 = vadd.xlane.f32.xlu0 %v491_v26 }
  0xbb   : > { %v493_v27 = vpop.xlane.xlu0 %492 }
  0xbc   : > { %v494_v28 = vrot.slane %v493_v27, 4 }
  0xbe   : > { %v495_v29 = vadd.f32 %v494_v28, %v493_v27 }
  0xc0   : > { %v496_v30 = vrot.slane %v495_v29, 2 }
  0xc2   : > { %v497_v31 = vadd.f32 %v496_v30, %v495_v29 }
  0xc4   : > { %v498_v32 = vrot.slane %v497_v31, 1 }
  0xc6   : > { %v499_v33 = vadd.f32 %v498_v32, %v497_v31 }
  0xc8   : > { %v500_v34 = vmul.f32 0.00048828125, %v499_v33 }
  0xca   : > { %v501_v35 = vsub.f32 %v1694_v3, %v500_v34  ;;  %v502_v36 = vsub.f32 %v1695_v4, %v500_v34  ;;  %v503_v37 = vsub.f32 %v1698_v5, %v500_v34  ;;  %v504_v38 = vsub.f32 %v1699_v6, %v500_v34  ;;  %v1922_v3 = vld [vmem:[%s2422_s6] sm:$0xff]   ;;  %v1923_v4 = vld [vmem:[%s2420_s4 + $0x8] sm:$0xff]  }
  0xcb   : > { %v505_v39 = vsub.f32 %v1702_v7, %v500_v34  ;;  %v506_v43 = vsub.f32 %v1703_v13, %v500_v34  ;;  %v507_v48 = vsub.f32 %v1706_v16, %v500_v34  ;;  %v508_v52 = vsub.f32 %v1707_v19, %v500_v34  ;;  %v1924_v5 = vld [vmem:[%s2422_s6 + $0x8] sm:$0xff]   ;;  %1800 = vmatprep.subr.bf16.mxu0 %v1922_v3  ;;  %v1925_v6 = vld [vmem:[%s2421_s5] sm:$0xff]  }
  0xcc   : > { %v509_v40 = vmul.f32 %v501_v35, %v501_v35  ;;  %v510_v41 = vmul.f32 %v502_v36, %v502_v36  ;;  %v511_v42 = vmul.f32 %v503_v37, %v503_v37  ;;  %v512_v44 = vmul.f32 %v504_v38, %v504_v38  ;;  %1801 = vmatpush3.bf16.msra.mxu0 %v1922_v3 }
  0xcd   : > { %v513_v49 = vmul.f32 %v505_v39, %v505_v39  ;;  %v514_v53 = vmul.f32 %v506_v43, %v506_v43  ;;  %v515_v56 = vmul.f32 %v507_v48, %v507_v48  ;;  %v516_v59 = vmul.f32 %v508_v52, %v508_v52  ;;  %1778 = vmatprep.subr.bf16.mxu1 %v1923_v4 }
  0xce   : > { %v517_v45 = vsel %vm476_vm0, %v509_v40, 0.0  ;;  %v518_v46 = vsel %vm476_vm0, %v510_v41, 0.0  ;;  %v520_v50 = vsel %vm476_vm0, %v511_v42, 0.0  ;;  %v522_v54 = vsel %vm476_vm0, %v512_v44, 0.0  ;;  %1802 = vmatprep.subr.bf16.mxu0 %v1924_v5  ;;  %1779 = vmatpush3.bf16.msra.mxu1 %v1923_v4 }
  0xcf   : > { %v519_v47 = vadd.f32 %v518_v46, %v517_v45  ;;  %v524_v57 = vsel %vm476_vm0, %v513_v49, 0.0  ;;  %v526_v60 = vsel %vm476_vm0, %v514_v53, 0.0  ;;  %v528_v62 = vsel %vm476_vm0, %v515_v56, 0.0  ;;  %1788 = vmatprep.subr.bf16.mxu1 %v1925_v6  ;;  %v1610_v49 = vld [vmem:[%s2423_s7] ss:$0 sm:$0xff] }
  0xd0   : > { %v530_v0 = vsel %vm476_vm0, %v516_v59, 0.0  ;;  %1803 = vmatpush3.bf16.msra.mxu0 %v1924_v5 }
  0xd1   : > { %v521_v51 = vadd.f32 %v520_v50, %v519_v47 }
  0xd3   : > { %v523_v55 = vadd.f32 %v522_v54, %v521_v51  ;;  %v1624_v51 = vld [vmem:[%s2425_s9] ss:$0 sm:$0xff] }
  0xd5   : > { %v525_v58 = vadd.f32 %v524_v57, %v523_v55 }
  0xd7   : > { %v527_v61 = vadd.f32 %v526_v60, %v525_v58 }
  0xd9   : > { %v529_v63 = vadd.f32 %v528_v62, %v527_v61 }
  0xdb   : > { %v531_v1 = vadd.f32 %v530_v0, %v529_v63 }
  0xdd   : > { %532 = vadd.xlane.f32.xlu0 %v531_v1 }
 0x16a   : > { %v533_v7 = vpop.xlane.xlu0 %532 }
 0x16b   : > { %v534_v8 = vrot.slane %v533_v7, 4 }
 0x16d   : > { %v535_v9 = vadd.f32 %v534_v8, %v533_v7 }
 0x16f   : > { %v536_v10 = vrot.slane %v535_v9, 2 }
 0x171   : > { %v537_v11 = vadd.f32 %v536_v10, %v535_v9 }
 0x173   : > { %v538_v12 = vrot.slane %v537_v11, 1 }
 0x175   : > { %v539_v13 = vadd.f32 %v538_v12, %v537_v11 }
 0x177   : > { %v540_v14 = vmul.f32 0.00048828125, %v539_v13 }
 0x179   : > { %v541_v15 = vadd.f32 1e-05, %v540_v14 }
 0x17b   : > { %1931 = vrsqrt.f32 %v541_v15 }
 0x185   : > { %v1932_v16 = vpop.eup %1931 }
 0x186   : > { %v543_v18 = vmul.f32 %v1932_v16, %v501_v35  ;;  %v544_v19 = vmul.f32 %v1932_v16, %v502_v36  ;;  %v545_v20 = vmul.f32 %v1932_v16, %v503_v37  ;;  %v546_v21 = vmul.f32 %v1932_v16, %v504_v38 }
 0x187   : > { %v547_v23 = vmul.f32 %v1932_v16, %v505_v39  ;;  %v548_v24 = vmul.f32 %v1932_v16, %v506_v43  ;;  %v549_v31 = vmul.f32 %v1932_v16, %v507_v48  ;;  %v550_v32 = vmul.f32 %v1932_v16, %v508_v52  ;;  %v1926_v39 = vld [vmem:[%s2421_s5 + $0x8] sm:$0xff]  }
 0x188   : > { %v558_v25 = vmul.f32 %v1608_v17, %v543_v18  ;;  %v559_v26 = vmul.f32 %v1608_v17, %v544_v19  ;;  %v560_v27 = vmul.f32 %v1608_v17, %v545_v20  ;;  %v561_v28 = vmul.f32 %v1608_v17, %v546_v21 }
 0x189   : > { %v562_v29 = vmul.f32 %v1608_v17, %v547_v23  ;;  %v563_v30 = vmul.f32 %v1608_v17, %v548_v24  ;;  %v564_v42 = vmul.f32 %v1608_v17, %v549_v31  ;;  %v565_v43 = vmul.f32 %v1608_v17, %v550_v32 }
 0x18a   : > { %v573_v33 = vadd.f32 %v1609_v22, %v558_v25  ;;  %v574_v34 = vadd.f32 %v1609_v22, %v559_v26  ;;  %v575_v35 = vadd.f32 %v1609_v22, %v560_v27  ;;  %v576_v36 = vadd.f32 %v1609_v22, %v561_v28  ;;  %v1617_v27 = vld [vmem:[%s2424_s8] ss:$0 sm:$0xff] }
 0x18b   : > { %v577_v37 = vadd.f32 %v1609_v22, %v562_v29  ;;  %v578_v38 = vadd.f32 %v1609_v22, %v563_v30  ;;  %v579_v45 = vadd.f32 %v1609_v22, %v564_v42  ;;  %v580_v46 = vadd.f32 %v1609_v22, %v565_v43 }
 0x18c   : > { %v581_v40 = vpack.c.bf16 %v574_v34, %v573_v33  ;;  %v582_v41 = vpack.c.bf16 %v576_v36, %v575_v35 }
 0x18d   : > { %v583_v44 = vpack.c.bf16 %v578_v38, %v577_v37  ;;  %v584_v47 = vpack.c.bf16 %v580_v46, %v579_v45 }
 0x18e   : > { %1780 = vmatprep.mubr.msk.bf16.mxu1 %vm476_vm0, %v581_v40  ;;  %1804 = vmatprep.mubr.msk.bf16.mxu0 %vm476_vm0, %v581_v40 }
 0x18f   : > { %1781 = vmatmul.mubr.msk.bf16.vlgmr.msra.gmra.mrb[0].mxu1 %vm476_vm0, %v582_v41  ;;  %1805 = vmatmul.mubr.msk.bf16.vlgmr.msra.gmra.mrb[0].mxu0 %vm476_vm0, %v582_v41 }
 0x190   : > { %1789 = vmatpush3.bf16.msra.mxu1 %v1925_v6  ;;  %1784 = vmatprep.mubr.msk.bf16.mxu1 %vm476_vm0, %v583_v44 }
 0x191   : > { %1808 = vmatprep.mubr.msk.bf16.mxu0 %vm476_vm0, %v583_v44  ;;  %1790 = vmatprep.subr.bf16.mxu1 %v1926_v39 }
 0x194   : > { %1791 = vmatpush3.bf16.msra.mxu1 %v1926_v39 }
 0x197   : > { %1785 = vmatmul.mubr.msk.bf16.gmra.mrb[4].mxu1 %vm476_vm0, %v584_v47  ;;  %1809 = vmatmul.mubr.msk.bf16.gmra.mrb[4].mxu0 %vm476_vm0, %v584_v47 }
 0x198   : > { %1792 = vmatprep.mubr.msk.bf16.mxu1 %vm476_vm0, %v581_v40 }
 0x19f   : > { %1793 = vmatmul.mubr.msk.bf16.vlgmr.msra.gmra.mrb[8].mxu1 %vm476_vm0, %v582_v41 }
 0x1a0   : > { %1796 = vmatprep.mubr.msk.bf16.mxu1 %vm476_vm0, %v583_v44 }
 0x1a7   : > { %1797 = vmatmul.mubr.msk.bf16.gmra.mrb[12].mxu1 %vm476_vm0, %v584_v47 }
 0x262   : > { %v1782_v48 = vpop.f32.mrb[0].mxu1  ;;  %v1806_v50 = vpop.f32.mrb[0].mxu0 }
 0x263   : > { %v654_v52 = vpop.f32.mrb[1].mxu1  ;;  %v830_v53 = vpop.f32.mrb[1].mxu0  ;;  %v2282_v56 = vadd.f32 %v1782_v48, %v1610_v49  ;;  %v839_v57 = vadd.f32 %v1806_v50, %v1624_v51 }
 0x264   : > { %v1783_v54 = vpop.f32.mrb[2].mxu1  ;;  %v1807_v55 = vpop.f32.mrb[2].mxu0  ;;  %v655_v62 = vadd.f32 %v1610_v49, %v654_v52  ;;  %v831_v63 = vadd.f32 %v1624_v51, %v830_v53 }
 0x265   : > { %v2284_v58 = vadd.f32 %v1783_v54, %v1610_v49  ;;  %v842_v59 = vadd.f32 %v1807_v55, %v1624_v51  ;;  %v657_v60 = vpop.f32.mrb[3].mxu1  ;;  %v833_v61 = vpop.f32.mrb[3].mxu0 }
 0x266   : > { %v658_v0 = vadd.f32 %v1610_v49, %v657_v60  ;;  %v834_v1 = vadd.f32 %v1624_v51, %v833_v61 }
 0x267   : > { %v862_v2 = vpack.c.bf16 %v2284_v58, %v2282_v56  ;;  %v870_v3 = vpack.c.bf16 %v842_v59, %v839_v57 }
 0x268   : > { %v861_v4 = vpack.c.bf16 %v658_v0, %v655_v62  ;;  %v869_v5 = vpack.c.bf16 %v834_v1, %v831_v63 }
 0x26a   : > { %v1786_v6 = vpop.f32.mrb[4].mxu1  ;;  %v1810_v7 = vpop.f32.mrb[4].mxu0  ;;  %1820 = vmatprep.mubr.msk.bf16.mxu1 %vm873_vm1, %v861_v4  ;;  %1828 = vmatprep.subr.bf16.mxu0 %v869_v5 }
 0x26b   : > { %v670_v8 = vpop.f32.mrb[5].mxu1  ;;  %v846_v9 = vpop.f32.mrb[5].mxu0  ;;  %1829 = vmatpush3.bf16.msra.mxu0 %v869_v5  ;;  %v679_v12 = vadd.f32 %v1786_v6, %v1610_v49  ;;  %v855_v13 = vadd.f32 %v1810_v7, %v1624_v51 }
 0x26c   : > { %v1787_v10 = vpop.f32.mrb[6].mxu1  ;;  %v1811_v11 = vpop.f32.mrb[6].mxu0  ;;  %1830 = vmatprep.subr.bf16.mxu0 %v870_v3  ;;  %v671_v18 = vadd.f32 %v1610_v49, %v670_v8  ;;  %v847_v19 = vadd.f32 %v1624_v51, %v846_v9 }
 0x26d   : > { %v682_v14 = vadd.f32 %v1787_v10, %v1610_v49  ;;  %v858_v15 = vadd.f32 %v1811_v11, %v1624_v51  ;;  %v673_v16 = vpop.f32.mrb[7].mxu1  ;;  %v849_v17 = vpop.f32.mrb[7].mxu0 }
 0x26e   : > { %v674_v20 = vadd.f32 %v1610_v49, %v673_v16  ;;  %v850_v21 = vadd.f32 %v1624_v51, %v849_v17 }
 0x26f   : > { %v864_v22 = vpack.c.bf16 %v682_v14, %v679_v12  ;;  %v872_v23 = vpack.c.bf16 %v858_v15, %v855_v13  ;;  %1831 = vmatpush3.bf16.msra.mxu0 %v870_v3 }
 0x270   : > { %v863_v24 = vpack.c.bf16 %v674_v20, %v671_v18  ;;  %v871_v25 = vpack.c.bf16 %v850_v21, %v847_v19 }
 0x272   : > { %v1794_v26 = vpop.f32.mrb[8].mxu1  ;;  %1832 = vmatprep.subr.bf16.mxu0 %v871_v25 }
 0x273   : > { %v742_v28 = vpop.f32.mrb[9].mxu1  ;;  %1833 = vmatpush3.bf16.msra.mxu0 %v871_v25  ;;  %v751_v30 = vadd.f32 %v1794_v26, %v1617_v27 }
 0x274   : > { %v1795_v29 = vpop.f32.mrb[10].mxu1  ;;  %1834 = vmatprep.subr.bf16.mxu0 %v872_v23  ;;  %v743_v33 = vadd.f32 %v1617_v27, %v742_v28 }
 0x275   : > { %v754_v31 = vadd.f32 %v1795_v29, %v1617_v27  ;;  %v745_v32 = vpop.f32.mrb[11].mxu1 }
 0x276   : > { %v746_v34 = vadd.f32 %v1617_v27, %v745_v32 }
 0x277   : > { %v866_v35 = vpack.c.bf16 %v754_v31, %v751_v30  ;;  %1835 = vmatpush3.bf16.msra.mxu0 %v872_v23 }
 0x278   : > { %v865_v36 = vpack.c.bf16 %v746_v34, %v743_v33 }
 0x279   : > { %v890_v48 = vsel %vm873_vm1, %v866_v35, 0 }
 0x27a   : > { %v1798_v37 = vpop.f32.mrb[12].mxu1  ;;  %1876 = vmatprep.subr.msk.bf16.mxu1 %vm873_vm1, %v865_v36  ;;  %v887_v38 = vsel %vm873_vm1, %v865_v36, 0 }
 0x27b   : > { %v758_v40 = vpop.f32.mrb[13].mxu1  ;;  %1813 = vmatpush3.bf16.xpose.msra.mxu1 %v887_v38  ;;  %v767_v39 = vadd.f32 %v1798_v37, %v1617_v27 }
 0x27c   : > { %v1799_v41 = vpop.f32.mrb[14].mxu1  ;;  %1877 = vmatprep.subr.msk.bf16.mxu1 %vm873_vm1, %v866_v35  ;;  %v759_v44 = vadd.f32 %v1617_v27, %v758_v40 }
 0x27d   : > { %v770_v42 = vadd.f32 %v1799_v41, %v1617_v27  ;;  %v761_v43 = vpop.f32.mrb[15].mxu1 }
 0x27e   : > { %v762_v45 = vadd.f32 %v1617_v27, %v761_v43 }
 0x27f   : > { %v868_v46 = vpack.c.bf16 %v770_v42, %v767_v39 }
 0x280   : > { %v867_v47 = vpack.c.bf16 %v762_v45, %v759_v44 }
 0x281   : > { %v896_v50 = vsel %vm873_vm1, %v868_v46, 0 }
 0x282   : > { %v893_v49 = vsel %vm873_vm1, %v867_v47, 0 }
 0x283   : > { %1815 = vmatpush3.bf16.xpose.msra.mxu1 %v890_v48 }
 0x284   : > { %1878 = vmatprep.subr.msk.bf16.mxu1 %vm873_vm1, %v867_v47 }
 0x28b   : > { %1817 = vmatpush3.bf16.xpose.msra.mxu1 %v893_v49 }
 0x28c   : > { %1879 = vmatprep.subr.msk.bf16.mxu1 %vm873_vm1, %v868_v46 }
 0x293   : > { %1819 = vmatpush3.bf16.xpose.msra.mxu1 %v896_v50 }
 0x29a   : > { %1821 = vmatmul.mubr.msk.bf16.vlgmr.msra.gmra.mrb[16].mxu1 %vm873_vm1, %v862_v2 }
 0x29b   : > { %1824 = vmatprep.mubr.msk.bf16.mxu1 %vm873_vm1, %v863_v24 }
 0x2a2   : > { %1825 = vmatmul.mubr.msk.bf16.gmra.mrb[20].mxu1 %vm873_vm1, %v864_v22 }
 0x36d   : > { %v1822_v51 = vpop.f32.mrb[16].mxu1 }
 0x36e   : > { %v932_v52 = vpop.f32.mrb[17].mxu1  ;;  %v970_v53 = vsel %vm963_vm2, %v1822_v51, -inf }
 0x36f   : > { %971 = vmax.xlane.f32.xlu0 %v970_v53  ;;  %v1823_v54 = vpop.f32.mrb[18].mxu1  ;;  %v964_v55 = vsel %vm963_vm2, %v932_v52, -inf }
 0x370   : > { %965 = vmax.xlane.f32.xlu1 %v964_v55  ;;  %v935_v57 = vpop.f32.mrb[19].mxu1  ;;  %v973_v61 = vsel %vm963_vm2, %v1823_v54, -inf }
 0x371   : > { %v967_v59 = vsel %vm963_vm2, %v935_v57, -inf }
 0x374   : > { %968 = vmax.xlane.f32.xlu1 %v967_v59 }
 0x375   : > { %v1826_v56 = vpop.f32.mrb[20].mxu1 }
 0x376   : > { %v948_v58 = vpop.f32.mrb[21].mxu1  ;;  %v982_v0 = vsel %vm963_vm2, %v1826_v56, -inf }
 0x377   : > { %v1827_v60 = vpop.f32.mrb[22].mxu1  ;;  %v976_v62 = vsel %vm963_vm2, %v948_v58, -inf }
 0x378   : > { %974 = vmax.xlane.f32.xlu1 %v973_v61  ;;  %977 = vmax.xlane.f32.xlu0 %v976_v62  ;;  %v951_v63 = vpop.f32.mrb[23].mxu1  ;;  %v985_v2 = vsel %vm963_vm2, %v1827_v60, -inf }
 0x379   : > { %v979_v1 = vsel %vm963_vm2, %v951_v63, -inf }
 0x37c   : > { %983 = vmax.xlane.f32.xlu0 %v982_v0  ;;  %980 = vmax.xlane.f32.xlu1 %v979_v1 }
 0x380   : > { %986 = vmax.xlane.f32.xlu1 %v985_v2 }
 0x3fc   : > { %v972_v3 = vpop.xlane.xlu0 %971 }
 0x3fd   : > { %v990_v4 = vsub.f32 %v1822_v51, %v972_v3  ;;  %v966_v5 = vpop.xlane.xlu1 %965 }
 0x3fe   : > { %v988_v6 = vsub.f32 %v932_v52, %v966_v5 }
 0x3ff   : > { %v1000_v7 = vmul.f32 1.442695, %v990_v4 }
 0x400   : > { %v996_v8 = vmul.f32 1.442695, %v988_v6 }
 0x401   : > { %v969_v9 = vpop.xlane.xlu1 %968 }
 0x402   : > { %1933 = vpow2.f32 %v996_v8  ;;  %v989_v10 = vsub.f32 %v935_v57, %v969_v9 }
 0x403   : > { %1935 = vpow2.f32 %v1000_v7  ;;  %v1727_v7 = vld [vmem:[%s458_s15 + $0x8] sm:$0xff]  }
 0x404   : > { %v998_v11 = vmul.f32 1.442695, %v989_v10  ;;  %v1714_v8 = vunpack.c.l.bf16 %v1727_v7  ;;  %v1715_v9 = vunpack.c.h.bf16 %v1727_v7 }
 0x405   : > { %v975_v12 = vpop.xlane.xlu1 %974  ;;  %v978_v13 = vpop.xlane.xlu0 %977 }
 0x406   : > { %1937 = vpow2.f32 %v998_v11  ;;  %v991_v14 = vsub.f32 %v1823_v54, %v975_v12  ;;  %v992_v15 = vsub.f32 %v948_v58, %v978_v13  ;;  %v1649_v10 = vmul.f32 -1.442695, %v1714_v8  ;;  %v1709_v12 = vld [vmem:[%s458_s15] sm:$0xff]  }
 0x407   : > { %v1650_v11 = vmul.f32 -1.442695, %v1715_v9  ;;  %v1710_v13 = vunpack.c.l.bf16 %v1709_v12 }
 0x408   : > { %v1002_v16 = vmul.f32 1.442695, %v991_v14  ;;  %v1004_v17 = vmul.f32 1.442695, %v992_v15  ;;  %v1711_v14 = vunpack.c.h.bf16 %v1709_v12 }
 0x409   : > { %v984_v18 = vpop.xlane.xlu0 %983  ;;  %v981_v19 = vpop.xlane.xlu1 %980  ;;  %v1647_v15 = vmul.f32 -1.442695, %v1710_v13 }
 0x40a   : > { %1939 = vpow2.f32 %v1002_v16  ;;  %v994_v20 = vsub.f32 %v1826_v56, %v984_v18  ;;  %v993_v21 = vsub.f32 %v951_v63, %v981_v19  ;;  %v1648_v16 = vmul.f32 -1.442695, %v1711_v14 }
 0x40b   : > { %1941 = vpow2.f32 %v1004_v17 }
 0x40c   : > { %v1934_v22 = vpop.eup %1933  ;;  %v1008_v23 = vmul.f32 1.442695, %v994_v20  ;;  %v1006_v24 = vmul.f32 1.442695, %v993_v21  ;;  %v1728_v21 = vld [vmem:[%s458_s15 + $0x10] sm:$0xff]  }
 0x40d   : > { %v987_v25 = vpop.xlane.xlu1 %986  ;;  %v1012_v26 = vsel %vm963_vm2, %v1934_v22, 0.0  ;;  %v1936_v27 = vpop.eup %1935 }
 0x40e   : > { %1943 = vpow2.f32 %v1008_v23  ;;  %v995_v28 = vsub.f32 %v1827_v60, %v987_v25  ;;  %1013 = vadd.xlane.f32.xlu0 %v1012_v26  ;;  %v1018_v31 = vsel %vm963_vm2, %v1936_v27, 0.0  ;;  %v1719_v23 = vunpack.c.h.bf16 %v1728_v21 }
 0x40f   : > { %1945 = vpow2.f32 %v1006_v24  ;;  %v1729_v24 = vld [vmem:[%s458_s15 + $0x18] sm:$0xff]   ;;  %s446_s15 = sand.u32 1, %s2083_s26  }
 0x410   : > { %v1938_v29 = vpop.eup %1937  ;;  %v1010_v30 = vmul.f32 1.442695, %v995_v28  ;;  %v1722_v25 = vunpack.c.l.bf16 %v1729_v24  ;;  %v1723_v26 = vunpack.c.h.bf16 %v1729_v24  ;;  %v1652_v28 = vmul.f32 -1.442695, %v1719_v23  ;;  %s1603_s21 = sshll.u32 %s446_s15, 5  ;;  %s2375_s29 = scalar_lea.sflag [#allocation3], %s446_s15 }
 0x411   : > { %v1015_v32 = vsel %vm963_vm2, %v1938_v29, 0.0  ;;  %s448_s16 = scalar_lea.vmem [#allocation2], %s1603_s21  ;;  %s2093_s21 = smov [#allocation2]  }
 0x412   : > { %1947 = vpow2.f32 %v1010_v30  ;;  %1019 = vadd.xlane.f32.xlu0 %v1018_v31  ;;  %1016 = vadd.xlane.f32.xlu1 %v1015_v32  ;;  %v1654_v30 = vmul.f32 -1.442695, %v1723_v26  ;;  %s1525_s23 = sshll.u32 %s448_s16, 4  ;;  %s2033_s22 = sshll.u32 %s2093_s21, 4  ;;  %s2368_s23 = int_to_ptr.vmem [resolvable:$true] %s1525_s23  ;;  %s2034_s22 = int_to_ptr.vmem [resolvable:$false] %s2033_s22 }
 0x413   : > { %s2029_s0 = scalar_lea.vmem %s2368_s23, 512  ;;  %s2035_s24 = scalar_lea.vmem %s2034_s22, 1024 }
 0x414   : > { %v1940_v33 = vpop.eup %1939  ;;  %p2030_p11 = scmp.ne.s32.totalorder %s2368_s23, %s2029_s0  ;;  %p2036_p0 = scmp.lt.s32.totalorder %s2368_s23, %s2034_s22 }
 0x415   : > { %v1942_v34 = vpop.eup %1941  ;;  %v1021_v35 = vsel %vm963_vm2, %v1940_v33, 0.0  ;;  %p2037_p1 = scmp.lt.s32.totalorder %s2035_s24, %s2029_s0 }
 0x416   : > { %v1024_v36 = vsel %vm963_vm2, %v1942_v34, 0.0  ;;  %1022 = vadd.xlane.f32.xlu1 %v1021_v35  ;;  %p2031_p12 = pnand %p2030_p11, %p2204_p5 }
 0x417   : > { %1025 = vadd.xlane.f32.xlu0 %v1024_v36  ;;  %p2038_p2 = por %p2037_p1, %p2036_p0 }
 0x418   : > { %v1944_v37 = vpop.eup %1943  ;;  %p2032_p13 = pneg %p2031_p12 }
 0x419   : > { %v1946_v38 = vpop.eup %1945  ;;  %v1030_v40 = vsel %vm963_vm2, %v1944_v37, 0.0 }
 0x41a   : > { %v1027_v41 = vsel %vm963_vm2, %v1946_v38, 0.0  ;;  %p2039_p3 = pnand %p2038_p2, %p2032_p13 }
 0x41b   : > { %1031 = vadd.xlane.f32.xlu0 %v1030_v40  ;;  %1028 = vadd.xlane.f32.xlu1 %v1027_v41  ;;  %v1927_v40 = vld [vmem:[%s2427_s11] sm:$0xff]  }
 0x41c   : > { %v1948_v39 = vpop.eup %1947  ;;  %1844 = vmatprep.subr.bf16.mxu0 %v1927_v40 }
 0x41d   : > { %v1033_v42 = vsel %vm963_vm2, %v1948_v39, 0.0 }
 0x41f   : > { %1034 = vadd.xlane.f32.xlu1 %v1033_v42 }
 0x49b   : > { %v1014_v43 = vpop.xlane.xlu0 %1013 }
 0x49c   : > { %1949 = vrcp.f32 %v1014_v43 }
 0x49f   : > { %v1020_v44 = vpop.xlane.xlu0 %1019  ;;  %v1017_v45 = vpop.xlane.xlu1 %1016 }
 0x4a0   : > { %1951 = vrcp.f32 %v1017_v45 }
 0x4a1   : > { %1953 = vrcp.f32 %v1020_v44 }
 0x4a3   : > { %v1023_v46 = vpop.xlane.xlu1 %1022 }
 0x4a4   : > { %v1026_v47 = vpop.xlane.xlu0 %1025  ;;  %1955 = vrcp.f32 %v1023_v46 }
 0x4a5   : > { %1957 = vrcp.f32 %v1026_v47 }
 0x4a6   : > { %v1950_v50 = vpop.eup %1949 }
 0x4a7   : > { %v1044_v54 = vmul.f32 %v1950_v50, %v1934_v22  ;;  %v1718_v22 = vunpack.c.l.bf16 %v1728_v21 }
 0x4a8   : > { %v1032_v48 = vpop.xlane.xlu0 %1031  ;;  %v1029_v49 = vpop.xlane.xlu1 %1028 }
 0x4a9   : > { %1959 = vrcp.f32 %v1029_v49  ;;  %v1928_v49 = vld [vmem:[%s2427_s11 + $0x8] sm:$0xff]  }
 0x4aa   : > { %v1952_v51 = vpop.eup %1951  ;;  %1961 = vrcp.f32 %v1032_v48 }
 0x4ab   : > { %v1954_v52 = vpop.eup %1953  ;;  %v1045_v55 = vmul.f32 %v1952_v51, %v1938_v29  ;;  %v1653_v29 = vmul.f32 -1.442695, %v1722_v25 }
 0x4ac   : > { %v1035_v53 = vpop.xlane.xlu1 %1034  ;;  %v1046_v56 = vmul.f32 %v1954_v52, %v1936_v27  ;;  %v1651_v27 = vmul.f32 -1.442695, %v1718_v22 }
 0x4ad   : > { %1963 = vrcp.f32 %v1035_v53  ;;  %v1052_v59 = vpack.c.bf16 %v1045_v55, %v1044_v54 }
 0x4ae   : > { %v1956_v57 = vpop.eup %1955  ;;  %1965 = vpow2.f32 %v1649_v10 }
 0x4af   : > { %v1047_v58 = vmul.f32 %v1956_v57, %v1940_v33  ;;  %1836 = vmatprep.mubr.msk.bf16.mxu0 %vm963_vm2, %v1052_v59  ;;  %v1958_v61 = vpop.eup %1957  ;;  %1967 = vpow2.f32 %v1650_v11 }
 0x4b0   : > { %v1048_v0 = vmul.f32 %v1958_v61, %v1942_v34  ;;  %1969 = vpow2.f32 %v1647_v15 }
 0x4b1   : > { %v1053_v60 = vpack.c.bf16 %v1047_v58, %v1046_v56  ;;  %1971 = vpow2.f32 %v1648_v16 }
 0x4b3   : > { %1837 = vmatmul.mubr.msk.bf16.vlgmr.msra.gmra.mrb[8].mxu0 %vm963_vm2, %v1053_v60  ;;  %v1960_v62 = vpop.eup %1959 }
 0x4b4   : > { %v1962_v63 = vpop.eup %1961  ;;  %v1049_v1 = vmul.f32 %v1960_v62, %v1946_v38  ;;  %1845 = vmatpush3.bf16.msra.mxu0 %v1927_v40  ;;  %v1929_v62 = vld [vmem:[%s2426_s10] sm:$0xff]  }
 0x4b5   : > { %v1050_v4 = vmul.f32 %v1962_v63, %v1944_v37  ;;  %1846 = vmatprep.subr.bf16.mxu0 %v1928_v49 }
 0x4b6   : > { %v1054_v3 = vpack.c.bf16 %v1049_v1, %v1048_v0 }
 0x4b7   : > { %v1964_v2 = vpop.eup %1963 }
 0x4b8   : > { %v1051_v5 = vmul.f32 %v1964_v2, %v1948_v39  ;;  %1840 = vmatprep.mubr.msk.bf16.mxu0 %vm963_vm2, %v1054_v3  ;;  %v1966_v17 = vpop.eup %1965  ;;  %1847 = vmatpush3.bf16.msra.mxu0 %v1928_v49  ;;  %v1930_v2 = vld [vmem:[%s2426_s10 + $0x8] sm:$0xff]  }
 0x4b9   : > { %v1968_v18 = vpop.eup %1967  ;;  %v1231_v19 = vadd.f32 1.0, %v1966_v17  ;;  %1856 = vmatprep.subr.bf16.mxu0 %v1929_v62 }
 0x4ba   : > { %v1055_v6 = vpack.c.bf16 %v1051_v5, %v1050_v4  ;;  %v1232_v20 = vadd.f32 1.0, %v1968_v18  ;;  %v1970_v31 = vpop.eup %1969 }
 0x4bb   : > { %1973 = vrcp.f32 %v1231_v19  ;;  %v1972_v32 = vpop.eup %1971  ;;  %v1229_v33 = vadd.f32 1.0, %v1970_v31 }
 0x4bc   : > { %1841 = vmatmul.mubr.msk.bf16.gmra.mrb[12].mxu0 %vm963_vm2, %v1055_v6  ;;  %1975 = vrcp.f32 %v1232_v20  ;;  %v1230_v34 = vadd.f32 1.0, %v1972_v32 }
 0x4bd   : > { %1977 = vpow2.f32 %v1651_v27 }
 0x4be   : > { %1979 = vpow2.f32 %v1652_v28 }
 0x4bf   : > { %1981 = vpow2.f32 %v1653_v29 }
 0x4c0   : > { %1983 = vpow2.f32 %v1654_v30 }
 0x4c1   : > { %1985 = vrcp.f32 %v1229_v33 }
 0x4c2   : > { %1987 = vrcp.f32 %v1230_v34 }
 0x4c5   : > { %v1974_v35 = vpop.eup %1973 }
 0x4c6   : > { %v1976_v36 = vpop.eup %1975  ;;  %v1255_v47 = vmul.f32 %v1974_v35, %v1714_v8 }
 0x4c7   : > { %v1978_v37 = vpop.eup %1977  ;;  %v1256_v48 = vmul.f32 %v1976_v36, %v1715_v9 }
 0x4c8   : > { %v1980_v38 = vpop.eup %1979  ;;  %v1233_v41 = vadd.f32 1.0, %v1978_v37 }
 0x4c9   : > { %v1982_v39 = vpop.eup %1981  ;;  %v1234_v42 = vadd.f32 1.0, %v1980_v38  ;;  %v1266_v54 = vpack.c.bf16 %v1256_v48, %v1255_v47 }
 0x4ca   : > { %v1984_v43 = vpop.eup %1983  ;;  %1989 = vrcp.f32 %v1233_v41  ;;  %v1235_v44 = vadd.f32 1.0, %v1982_v39 }
 0x4cb   : > { %1991 = vrcp.f32 %v1234_v42  ;;  %v1236_v45 = vadd.f32 1.0, %v1984_v43  ;;  %v1986_v46 = vpop.eup %1985 }
 0x4cc   : > { %1993 = vrcp.f32 %v1235_v44  ;;  %v1988_v50 = vpop.eup %1987  ;;  %v1253_v51 = vmul.f32 %v1986_v46, %v1710_v13 }
 0x4cd   : > { %1995 = vrcp.f32 %v1236_v45  ;;  %v1254_v52 = vmul.f32 %v1988_v50, %v1711_v14 }
 0x4cf   : > { %v1265_v53 = vpack.c.bf16 %v1254_v52, %v1253_v51 }
 0x4d1   : > { %1848 = vmatprep.mubr.msk.bf16.mxu0 %vm476_vm0, %v1265_v53 }
 0x4d2   : > { %1849 = vmatmul.mubr.msk.bf16.vlgmr.msra.gmra.mrb[16].mxu0 %vm476_vm0, %v1266_v54 }
 0x4d3   : > { %1857 = vmatpush3.bf16.msra.mxu0 %v1929_v62 }
 0x4d4   : > { %v1990_v55 = vpop.eup %1989  ;;  %1858 = vmatprep.subr.bf16.mxu0 %v1930_v2 }
 0x4d5   : > { %v1992_v57 = vpop.eup %1991  ;;  %v1257_v59 = vmul.f32 %v1990_v55, %v1718_v22  ;;  %v1667_v55 = vld [vmem:[%s2428_s12] ss:$0 sm:$0xff] }
 0x4d6   : > { %v1994_v56 = vpop.eup %1993  ;;  %v1258_v58 = vmul.f32 %v1992_v57, %v1719_v23 }
 0x4d7   : > { %v1996_v60 = vpop.eup %1995  ;;  %v1259_v61 = vmul.f32 %v1994_v56, %v1722_v25  ;;  %1859 = vmatpush3.bf16.msra.mxu0 %v1930_v2 }
 0x4d8   : > { %v1267_v63 = vpack.c.bf16 %v1258_v58, %v1257_v59  ;;  %v1260_v0 = vmul.f32 %v1996_v60, %v1723_v26 }
 0x4da   : > { %1852 = vmatprep.mubr.msk.bf16.mxu0 %vm476_vm0, %v1267_v63  ;;  %v1268_v1 = vpack.c.bf16 %v1260_v0, %v1259_v61 }
 0x4dc   : > { %1853 = vmatmul.mubr.msk.bf16.gmra.mrb[20].mxu0 %vm476_vm0, %v1268_v1 }
 0x586   : > { %v1838_v3 = vpop.f32.mrb[8].mxu0 }
 0x587   : > { %v1641_v4 = vmul.f32 -1.442695, %v1838_v3  ;;  %v1102_v5 = vpop.f32.mrb[9].mxu0 }
 0x588   : > { %v1639_v6 = vmul.f32 -1.442695, %v1102_v5  ;;  %v1839_v7 = vpop.f32.mrb[10].mxu0 }
 0x589   : > { %1997 = vpow2.f32 %v1641_v4  ;;  %v1642_v8 = vmul.f32 -1.442695, %v1839_v7  ;;  %v1105_v9 = vpop.f32.mrb[11].mxu0 }
 0x58a   : > { %1999 = vpow2.f32 %v1639_v6  ;;  %v1640_v10 = vmul.f32 -1.442695, %v1105_v9 }
 0x58b   : > { %2001 = vpow2.f32 %v1642_v8 }
 0x58c   : > { %2003 = vpow2.f32 %v1640_v10 }
 0x58f   : > { %v1842_v11 = vpop.f32.mrb[12].mxu0 }
 0x590   : > { %v1645_v12 = vmul.f32 -1.442695, %v1842_v11  ;;  %v1118_v13 = vpop.f32.mrb[13].mxu0 }
 0x591   : > { %v1643_v14 = vmul.f32 -1.442695, %v1118_v13  ;;  %v1843_v15 = vpop.f32.mrb[14].mxu0 }
 0x592   : > { %2005 = vpow2.f32 %v1645_v12  ;;  %v1646_v16 = vmul.f32 -1.442695, %v1843_v15  ;;  %v1121_v17 = vpop.f32.mrb[15].mxu0 }
 0x593   : > { %v1998_v18 = vpop.eup %1997  ;;  %2007 = vpow2.f32 %v1643_v14  ;;  %v1644_v19 = vmul.f32 -1.442695, %v1121_v17 }
 0x594   : > { %v2000_v20 = vpop.eup %1999  ;;  %v1159_v21 = vadd.f32 1.0, %v1998_v18  ;;  %2009 = vpow2.f32 %v1646_v16 }
 0x595   : > { %v2002_v22 = vpop.eup %2001  ;;  %v1157_v23 = vadd.f32 1.0, %v2000_v20  ;;  %2011 = vpow2.f32 %v1644_v19 }
 0x596   : > { %v2004_v24 = vpop.eup %2003  ;;  %2013 = vrcp.f32 %v1159_v21  ;;  %v1160_v25 = vadd.f32 1.0, %v2002_v22 }
 0x597   : > { %2015 = vrcp.f32 %v1157_v23  ;;  %v1158_v26 = vadd.f32 1.0, %v2004_v24 }
 0x598   : > { %2017 = vrcp.f32 %v1160_v25 }
 0x599   : > { %2019 = vrcp.f32 %v1158_v26 }
 0x59c   : > { %v2006_v27 = vpop.eup %2005 }
 0x59d   : > { %v2008_v28 = vpop.eup %2007  ;;  %v1163_v29 = vadd.f32 1.0, %v2006_v27 }
 0x59e   : > { %v2010_v30 = vpop.eup %2009  ;;  %v1161_v31 = vadd.f32 1.0, %v2008_v28 }
 0x59f   : > { %v2012_v32 = vpop.eup %2011  ;;  %2021 = vrcp.f32 %v1163_v29  ;;  %v1164_v33 = vadd.f32 1.0, %v2010_v30 }
 0x5a0   : > { %v2014_v34 = vpop.eup %2013  ;;  %2023 = vrcp.f32 %v1161_v31  ;;  %v1162_v35 = vadd.f32 1.0, %v2012_v32 }
 0x5a1   : > { %v2016_v36 = vpop.eup %2015  ;;  %2025 = vrcp.f32 %v1164_v33  ;;  %v1183_v40 = vmul.f32 %v2014_v34, %v1838_v3 }
 0x5a2   : > { %v2018_v37 = vpop.eup %2017  ;;  %2027 = vrcp.f32 %v1162_v35  ;;  %v1181_v39 = vmul.f32 %v2016_v36, %v1102_v5 }
 0x5a3   : > { %v2020_v38 = vpop.eup %2019  ;;  %v1184_v41 = vmul.f32 %v2018_v37, %v1839_v7 }
 0x5a4   : > { %v1182_v42 = vmul.f32 %v2020_v38, %v1105_v9 }
 0x5a5   : > { %v1262_v43 = vpack.c.bf16 %v1184_v41, %v1183_v40 }
 0x5a6   : > { %v1261_v44 = vpack.c.bf16 %v1182_v42, %v1181_v39 }
 0x5a8   : > { %1860 = vmatprep.mubr.msk.bf16.mxu0 %vm476_vm0, %v1261_v44 }
 0x5a9   : > { %v2022_v45 = vpop.eup %2021  ;;  %1861 = vmatmul.mubr.msk.bf16.vlgmr.msra.gmra.mrb[16].mxu0 %vm476_vm0, %v1262_v43 }
 0x5aa   : > { %v2024_v46 = vpop.eup %2023  ;;  %v1187_v49 = vmul.f32 %v2022_v45, %v1842_v11 }
 0x5ab   : > { %v2026_v47 = vpop.eup %2025  ;;  %v1185_v51 = vmul.f32 %v2024_v46, %v1118_v13 }
 0x5ac   : > { %v2028_v48 = vpop.eup %2027  ;;  %v1188_v50 = vmul.f32 %v2026_v47, %v1843_v15 }
 0x5ad   : > { %v1186_v52 = vmul.f32 %v2028_v48, %v1121_v17 }
 0x5ae   : > { %v1264_v53 = vpack.c.bf16 %v1188_v50, %v1187_v49 }
 0x5af   : > { %v1263_v54 = vpack.c.bf16 %v1186_v52, %v1185_v51 }
 0x5b1   : > { %1864 = vmatprep.mubr.msk.bf16.mxu0 %vm476_vm0, %v1263_v54 }
 0x5b2   : > { %1865 = vmatmul.mubr.msk.bf16.gmra.mrb[20].mxu0 %vm476_vm0, %v1264_v53 }
 0x67c   : > { %v1862_v57 = vpop.f32.mrb[16].mxu0 }
 0x67d   : > { %v1464_v59 = vadd.f32 %v1862_v57, %v1667_v55  ;;  %v1424_v56 = vpop.f32.mrb[17].mxu0 }
 0x67e   : > { %v1462_v58 = vadd.f32 %v1667_v55, %v1424_v56  ;;  %v1863_v60 = vpop.f32.mrb[18].mxu0 }
 0x67f   : > { %v1685_v61 = vpack.c.bf16 %v1464_v59, %v1464_v59  ;;  %v1465_v62 = vadd.f32 %v1863_v60, %v1667_v55  ;;  %v1427_v63 = vpop.f32.mrb[19].mxu0 }
 0x680   : > { %v1683_v0 = vpack.c.bf16 %v1462_v58, %v1462_v58  ;;  %v1463_v1 = vadd.f32 %v1667_v55, %v1427_v63 }
 0x681   : > { %1505 = vst.msk [vmem:[%s448_s16 + $0x8] sm:$0xf] %vm1502_vm3, %v1685_v61  ;;  %v1686_v2 = vpack.c.bf16 %v1465_v62, %v1465_v62 }
 0x682   : > { %1503 = vst.msk [vmem:[%s448_s16] sm:$0xf] %vm1502_vm3, %v1683_v0  ;;  %v1684_v3 = vpack.c.bf16 %v1463_v1, %v1463_v1 }
 0x683   : > { %1506 = vst.msk [vmem:[%s448_s16 + $0xc] sm:$0xf] %vm1502_vm3, %v1686_v2 }
 0x684   : > { %1504 = vst.msk [vmem:[%s448_s16 + $0x4] sm:$0xf] %vm1502_vm3, %v1684_v3 }
 0x685   : > { %v1866_v4 = vpop.f32.mrb[20].mxu0 }
 0x686   : > { %v1468_v5 = vadd.f32 %v1866_v4, %v1667_v55  ;;  %v1440_v6 = vpop.f32.mrb[21].mxu0 }
 0x687   : > { %v1466_v7 = vadd.f32 %v1667_v55, %v1440_v6  ;;  %v1867_v8 = vpop.f32.mrb[22].mxu0 }
 0x688   : > { %v1689_v9 = vpack.c.bf16 %v1468_v5, %v1468_v5  ;;  %v1469_v10 = vadd.f32 %v1867_v8, %v1667_v55  ;;  %v1443_v11 = vpop.f32.mrb[23].mxu0 }
 0x689   : > { %v1687_v12 = vpack.c.bf16 %v1466_v7, %v1466_v7  ;;  %v1467_v13 = vadd.f32 %v1667_v55, %v1443_v11 }
 0x68a   : > { %1509 = vst.msk [vmem:[%s448_s16 + $0x18] sm:$0xf] %vm1502_vm3, %v1689_v9  ;;  %v1690_v14 = vpack.c.bf16 %v1469_v10, %v1469_v10 }
 0x68b   : > { %1507 = vst.msk [vmem:[%s448_s16 + $0x10] sm:$0xf] %vm1502_vm3, %v1687_v12  ;;  %v1688_v15 = vpack.c.bf16 %v1467_v13, %v1467_v13 }
 0x68c   : > { %1510 = vst.msk [vmem:[%s448_s16 + $0x1c] sm:$0xf] %vm1502_vm3, %v1690_v14 }
 0x68d   : > { %1508 = vst.msk [vmem:[%s448_s16 + $0x14] sm:$0xf] %vm1502_vm3, %v1688_v15 }
 0x68e   : > { %2042 = shalt.err (!%p2039_p3)
}
 0x68f   : > { %s2043_s15 = scalar_lea.hbm %s2366_s20, 512  ;;  %s2047_s21 = scalar_lea.hbm %s2429_s13, 2048 }
 0x690   : > { %p2044_p4 = scmp.ne.s32.totalorder %s2366_s20, %s2043_s15  ;;  %p2048_p9 = scmp.lt.u32.totalorder %s2366_s20, %s2429_s13 }
 0x691   : > { %p2049_p10 = scmp.lt.u32.totalorder %s2047_s21, %s2043_s15  ;;  %p2051_p12 = scmp.lt.u32.totalorder %s2043_s15, %s2366_s20 }
 0x692   : > { %p2045_p7 = pnand %p2044_p4, %p2204_p5 }
 0x693   : > { %p2050_p11 = por %p2049_p10, %p2048_p9 }
 0x694   : > { %p2046_p8 = pneg %p2045_p7 }
 0x695   : > { %p2052_p13 = por %p2051_p12, %p2050_p11 }
 0x697   : > { %p2053_p0 = pnand %p2052_p13, %p2046_p8 }
 0x699   : > { %2056 = shalt.err (!%p2053_p0)
}
 0x69a   : > { %s2094_s0 = smov 64   ;;  %s2095_s24 = smov 4  }
 0x69b   : > { %1880 = dma.vmem_to_hbm [thread:$0]  (%p2204_p5), %s2368_s23, 512, %s2366_s20, %s2375_s29, %s2094_s0, %s2094_s0, %s2095_s24  }
 0x69c PF: > { %p1886_p1 = scmp.ge.s32.totalorder %s2091_s28, 2  ;;  %s1540_s1 = sand.u32 1, %s2079_s25  }
 0x69d   : > { %s1541_s15 = scalar_lea.sflag [#allocation3], %s1540_s1 }
 0x69e   : > { %p1883_p2 = pnand %p1886_p1, %p2208_p6 }
 0x6a0   : > { %2074 = dma.done.wait (!%p1883_p2), %s1541_s15, 512  }
 0x6a1   : > { %2076 = vsyncadd (!%p1883_p2), %s1541_s15, 4294966784  ;;  %p23_p3 = scmp.ge.s32.totalorder %s2191_s14, 6   ;;  %s2438_s25 = smov %s2083_s26 }
 0x6a2   : > { %s2439_s26 = smov %s2087_s27  ;;  %s2440_s27 = smov %s2202_s17 }
 0x6a3   : > { %s2441_s28 = smov %s2191_s14  ;;  %25 = sbr.rel (!%p23_p3) target bundleno = 6 (0x6), region = 110 }
 0x6aa   :  { %1546 = vsyncpa [#allocation3], 1 }
 0x6ab   :  { %1548 = vsyncpa [#allocation3 + $0x1], 1 }

</bundles_post_ra>
